<compile_context>
chip_gen: v7x
topology: tpu7x:2x2x1
jax: 0.10.0
libtpu: 0.0.40
codegen_flags: <defaults>
</compile_context>

<pallas_src>
import functools

import jax
import jax.numpy as jnp
from jax import lax
from jax.experimental import pallas as pl
from jax.experimental.pallas import tpu as pltpu


def temporal_block_kernel(x_ref, w1_ref, b1_ref, w2_ref, b2_ref, wd_ref, bd_ref,
                          o_ref, *, L, K, dil, pad, use_downsample):
    """Processes a block of TB batch elements.

    x_ref : (TB, L, Cin)            bf16 input (unpadded time axis)
    w1_ref: (K*Cin,  Coutp)         conv1 weight, taps flattened, bf16
    w2_ref: (K*Coutp, Coutp)        conv2 weight, taps flattened, bf16
    wd_ref: (Cin, Coutp)            1x1 downsample weight, bf16 (unused if identity)
    b*_ref: (1, Coutp)              f32 biases
    o_ref : (TB, L, Coutp)          f32 output (padded lanes are exactly 0)
    """
    TB, _, cin = x_ref.shape
    coutp = b1_ref.shape[1]

    def causal_taps(val, c):
        # Left-pad `val` (TB, L, c) with `pad` zero rows (causal / chomp),
        # gather the K dilated taps and lay them out tap-major along lanes:
        # result (TB*L, K*c) feeds a single MXU matmul.
        if pad > 0:
            val = jnp.concatenate(
                [jnp.zeros((TB, pad, c), val.dtype), val], axis=1)
        taps = jnp.concatenate(
            [val[:, k * dil:k * dil + L, :] for k in range(K)], axis=-1)
        return taps.reshape(TB * L, K * c)

    x = x_ref[...]                                          # (TB, L, cin) bf16

    # ---- conv1 (causal dilated, K taps fused) + bias + ReLU ----------------
    y1 = jnp.dot(causal_taps(x, cin), w1_ref[...],
                 preferred_element_type=jnp.float32).reshape(TB, L, coutp)
    y1 = jnp.maximum(y1 + b1_ref[...], 0.0)
    # dropout1: identity (eval mode)

    # ---- conv2 (causal dilated, K taps fused) + bias + ReLU ----------------
    y2 = jnp.dot(causal_taps(y1.astype(jnp.bfloat16), coutp), w2_ref[...],
                 preferred_element_type=jnp.float32).reshape(TB, L, coutp)
    y2 = jnp.maximum(y2 + b2_ref[...], 0.0)
    # dropout2: identity (eval mode)

    # ---- residual ----------------------------------------------------------
    if use_downsample:
        res = jnp.dot(x.reshape(TB * L, cin), wd_ref[...],
                      preferred_element_type=jnp.float32).reshape(TB, L, coutp)
        res = res + bd_ref[...]
    else:
        # n_inputs == n_outputs: residual is x itself (no 1x1 conv), lane-pad to Coutp
        res = x.astype(jnp.float32)
        if coutp > cin:
            res = jnp.concatenate(
                [res, jnp.zeros((TB, L, coutp - cin), jnp.float32)], axis=-1)

    o_ref[...] = jnp.maximum(y2 + res, 0.0)


def _round_up(x, m):
    return ((x + m - 1) // m) * m


def _pick_block_b(B, L):
    # Target ~1024 time-rows of work per grid step (amortize ~0.35us/step),
    # but keep >=2 grid steps when B >= 2 so the parallel axis can be split
    # across v7x's two TensorCores.
    tb = max(1, min(B, 1024 // max(L, 1)))
    if B >= 2:
        tb = min(tb, (B + 1) // 2)
    return tb


def temporal_block(x_ncl, params, *, kernel_size, dilation):
    """x_ncl: (B, Cin, L) float32 (PyTorch NCL). Returns (B, Cout, L) float32."""
    B, Cin, L = x_ncl.shape
    K = kernel_size
    pad = (K - 1) * dilation
    Cout = params["w1"].shape[0]
    Coutp = _round_up(Cout, 128)          # lane-dense output channels
    use_downsample = "wd" in params       # mirrors PyTorch (only if Cin != Cout)

    def pad_last(a, n):
        return jnp.pad(a, [(0, 0)] * (a.ndim - 1) + [(0, n - a.shape[-1])])

    # conv1 weight: (Cout, Cin, K) -> (K, Cin, Coutp) -> (K*Cin, Coutp), bf16
    w1_k = pad_last(jnp.transpose(params["w1"], (2, 1, 0)), Coutp)
    w1_k = w1_k.reshape(K * Cin, Coutp).astype(jnp.bfloat16)
    # conv2 weight: (Cout, Cout, K) -> (K, Coutp, Coutp) -> (K*Coutp, Coutp), bf16
    w2_k = jnp.transpose(params["w2"], (2, 1, 0))
    w2_k = jnp.pad(w2_k, ((0, 0), (0, Coutp - Cout), (0, Coutp - Cout)))
    w2_k = w2_k.reshape(K * Coutp, Coutp).astype(jnp.bfloat16)
    b1 = pad_last(params["b1"], Coutp).reshape(1, Coutp).astype(jnp.float32)
    b2 = pad_last(params["b2"], Coutp).reshape(1, Coutp).astype(jnp.float32)
    if use_downsample:
        wd_k = pad_last(jnp.transpose(params["wd"], (1, 0)), Coutp).astype(jnp.bfloat16)
        bd = pad_last(params["bd"], Coutp).reshape(1, Coutp).astype(jnp.float32)
    else:
        wd_k = jnp.zeros((Cin, Coutp), jnp.bfloat16)   # unused by the kernel
        bd = jnp.zeros((1, Coutp), jnp.float32)

    # NCL -> BTC (channels on lanes), bf16 activations.  The causal left-pad is
    # done in-kernel, so no padded copy of x is materialized in HBM.
    x_btc = jnp.transpose(x_ncl, (0, 2, 1)).astype(jnp.bfloat16)

    tb = _pick_block_b(B, L)
    grid_b = -(-B // tb)                  # cdiv
    Bp = grid_b * tb
    if Bp != B:
        x_btc = jnp.pad(x_btc, ((0, Bp - B), (0, 0), (0, 0)))

    kern = functools.partial(temporal_block_kernel, L=L, K=K, dil=dilation,
                             pad=pad, use_downsample=use_downsample)

    out_btc = pl.pallas_call(
        kern,
        out_shape=jax.ShapeDtypeStruct((Bp, L, Coutp), jnp.float32),
        grid_spec=pltpu.PrefetchScalarGridSpec(
            num_scalar_prefetch=0,
            grid=(grid_b,),
            in_specs=[
                pl.BlockSpec((tb, L, Cin), lambda b: (b, 0, 0)),       # x
                pl.BlockSpec((K * Cin, Coutp), lambda b: (0, 0)),      # w1
                pl.BlockSpec((1, Coutp), lambda b: (0, 0)),            # b1
                pl.BlockSpec((K * Coutp, Coutp), lambda b: (0, 0)),    # w2
                pl.BlockSpec((1, Coutp), lambda b: (0, 0)),            # b2
                pl.BlockSpec((Cin, Coutp), lambda b: (0, 0)),          # wd
                pl.BlockSpec((1, Coutp), lambda b: (0, 0)),            # bd
            ],
            out_specs=pl.BlockSpec((tb, L, Coutp), lambda b: (b, 0, 0)),
        ),
        compiler_params=pltpu.CompilerParams(dimension_semantics=("parallel",)),
    )(x_btc, w1_k, b1, w2_k, b2, wd_k, bd)

    out = out_btc[:B, :, :Cout]                 # crop batch & lane padding
    return jnp.transpose(out, (0, 2, 1))        # back to NCL


def _weight_norm(v, g):
    # PyTorch weight_norm with dim=0: w[o] = g[o] * v[o] / ||v[o]||_2
    norm = jnp.sqrt(jnp.sum(v * v, axis=tuple(range(1, v.ndim)), keepdims=True))
    gshape = (v.shape[0],) + (1,) * (v.ndim - 1)
    return g.reshape(gshape) * v / norm


def init_params(key, n_inputs, n_outputs, kernel_size):
    ks = jax.random.split(key, 8)
    v1 = 0.01 * jax.random.normal(ks[0], (n_outputs, n_inputs, kernel_size), jnp.float32)
    g1 = 1.0 + 0.1 * jax.random.normal(ks[1], (n_outputs,), jnp.float32)
    b1 = 0.05 * jax.random.normal(ks[2], (n_outputs,), jnp.float32)
    v2 = 0.01 * jax.random.normal(ks[3], (n_outputs, n_outputs, kernel_size), jnp.float32)
    g2 = 1.0 + 0.1 * jax.random.normal(ks[4], (n_outputs,), jnp.float32)
    b2 = 0.05 * jax.random.normal(ks[5], (n_outputs,), jnp.float32)

    params = {"w1": _weight_norm(v1, g1), "b1": b1,
              "w2": _weight_norm(v2, g2), "b2": b2}
    if n_inputs != n_outputs:   # PyTorch only creates the 1x1 downsample in this case
        params["wd"] = 0.01 * jax.random.normal(ks[6], (n_outputs, n_inputs), jnp.float32)
        params["bd"] = 0.05 * jax.random.normal(ks[7], (n_outputs,), jnp.float32)
    return params


def reference_forward(x_ncl, params, *, kernel_size, dilation,
                      compute_dtype=jnp.float32):
    """Pure-JAX reference mirroring the PyTorch forward (eval mode).

    compute_dtype=bfloat16 mimics the kernel's mixed precision (bf16 inputs /
    weights / intermediate activation, f32 accumulation), so the comparison
    against the kernel differs only by summation order.
    """
    L = x_ncl.shape[2]
    pad = (kernel_size - 1) * dilation
    cast = lambda a: a.astype(compute_dtype).astype(jnp.float32)

    def conv1d(x, w, b, dil, p):
        y = lax.conv_general_dilated(
            cast(x), cast(w), window_strides=(1,), padding=[(p, p)],
            rhs_dilation=(dil,), dimension_numbers=("NCH", "OIH", "NCH"),
            precision=lax.Precision.HIGHEST)
        return y + b[None, :, None]

    y = conv1d(x_ncl, params["w1"], params["b1"], dilation, pad)[:, :, :L]  # chomp
    y = jnp.maximum(y, 0.0)
    y = conv1d(y, params["w2"], params["b2"], dilation, pad)[:, :, :L]      # chomp
    y = jnp.maximum(y, 0.0)
    if "wd" in params:
        res = conv1d(x_ncl, params["wd"][:, :, None], params["bd"], 1, 0)
    else:
        res = cast(x_ncl)
    return jnp.maximum(y + res, 0.0)


if __name__ == "__main__":
    # TemporalBlock(n_inputs=4, n_outputs=8, kernel_size=3, stride=1,
    #               dilation=2, padding=(3-1)*2=4)
    B, Cin, Cout, L = 2, 4, 8, 16
    K, dilation = 3, 2

    key = jax.random.PRNGKey(0)
    kx, kp = jax.random.split(key)
    x = jax.random.normal(kx, (B, Cin, L), jnp.float32)
    params = init_params(kp, Cin, Cout, K)

    out = temporal_block(x, params, kernel_size=K, dilation=dilation)
    out = jax.block_until_ready(out)
    assert out.shape == (B, Cout, L), out.shape

    # Precision-matched reference (bf16 inputs/weights, f32 accumulation):
    # remaining difference is accumulation order only.
    ref_bf16 = reference_forward(x, params, kernel_size=K, dilation=dilation,
                                 compute_dtype=jnp.bfloat16)
    assert jnp.allclose(out, ref_bf16, atol=1e-4, rtol=1e-4), \
        float(jnp.max(jnp.abs(out - ref_bf16)))

    # Coarse sanity check against the full-f32 PyTorch-equivalent forward.
    ref_f32 = reference_forward(x, params, kernel_size=K, dilation=dilation)
    assert jnp.allclose(out, ref_f32, atol=1e-1, rtol=1e-1), \
        float(jnp.max(jnp.abs(out - ref_f32)))

    print("KERNEL_OK")
</pallas_src>

<mosaic_0001>
module attributes {stable_mosaic.version = 11 : i64} {
  func.func @temporal_block_kernel(%arg0: i32, %arg1: memref<1x16x4xbf16, #tpu.memory_space<vmem>>, %arg2: memref<12x128xbf16, #tpu.memory_space<vmem>>, %arg3: memref<1x128xf32, #tpu.memory_space<vmem>>, %arg4: memref<384x128xbf16, #tpu.memory_space<vmem>>, %arg5: memref<1x128xf32, #tpu.memory_space<vmem>>, %arg6: memref<4x128xbf16, #tpu.memory_space<vmem>>, %arg7: memref<1x128xf32, #tpu.memory_space<vmem>>, %arg8: memref<1x16x128xf32, #tpu.memory_space<vmem>>) attributes {dimension_semantics = [#tpu.dimension_semantics<parallel>], iteration_bounds = array<i64: 2>, scalar_prefetch = 0 : i64, scratch_operands = 0 : i64, tpu.core_type = #tpu.core_type<tc>, window_params = [{transform_indices = @transform_0, window_bounds = array<i64: 1, 16, 4>}, {pipeline_mode = #tpu.pipeline_mode<synchronous>, transform_indices = @transform_1, window_bounds = array<i64: 12, 128>}, {pipeline_mode = #tpu.pipeline_mode<synchronous>, transform_indices = @transform_2, window_bounds = array<i64: 1, 128>}, {pipeline_mode = #tpu.pipeline_mode<synchronous>, transform_indices = @transform_3, window_bounds = array<i64: 384, 128>}, {pipeline_mode = #tpu.pipeline_mode<synchronous>, transform_indices = @transform_4, window_bounds = array<i64: 1, 128>}, {pipeline_mode = #tpu.pipeline_mode<synchronous>, transform_indices = @transform_5, window_bounds = array<i64: 4, 128>}, {pipeline_mode = #tpu.pipeline_mode<synchronous>, transform_indices = @transform_6, window_bounds = array<i64: 1, 128>}, {transform_indices = @transform_7, window_bounds = array<i64: 1, 16, 128>}]} {
    %c0 = arith.constant 0 : index
    %c0_0 = arith.constant 0 : index
    %c0_1 = arith.constant 0 : index
    %0 = vector.load %arg1[%c0, %c0_0, %c0_1] : memref<1x16x4xbf16, #tpu.memory_space<vmem>>, vector<1x16x4xbf16>
    %cst = arith.constant 0.000000e+00 : bf16
    %1 = vector.broadcast %cst : bf16 to vector<1x4x4xbf16>
    %2 = tpu.concatenate %1, %0 in 1 : vector<1x4x4xbf16>, vector<1x16x4xbf16> -> vector<1x20x4xbf16>
    %3 = vector.extract_strided_slice %2 {offsets = [0, 0, 0], sizes = [1, 16, 4], strides = [1, 1, 1]} : vector<1x20x4xbf16> to vector<1x16x4xbf16>
    %4 = vector.extract_strided_slice %2 {offsets = [0, 2, 0], sizes = [1, 16, 4], strides = [1, 1, 1]} : vector<1x20x4xbf16> to vector<1x16x4xbf16>
    %5 = vector.extract_strided_slice %2 {offsets = [0, 4, 0], sizes = [1, 16, 4], strides = [1, 1, 1]} : vector<1x20x4xbf16> to vector<1x16x4xbf16>
    %6 = tpu.concatenate %3, %4, %5 in 2 : vector<1x16x4xbf16>, vector<1x16x4xbf16>, vector<1x16x4xbf16> -> vector<1x16x12xbf16>
    %7 = vector.shape_cast %6 : vector<1x16x12xbf16> to vector<16x12xbf16>
    %c0_2 = arith.constant 0 : index
    %c0_3 = arith.constant 0 : index
    %8 = vector.load %arg2[%c0_2, %c0_3] : memref<12x128xbf16, #tpu.memory_space<vmem>>, vector<12x128xbf16>
    %cst_4 = arith.constant dense<0.000000e+00> : vector<16x128xf32>
    %9 = tpu.matmul %7, %8, %cst_4 {dimension_numbers = #tpu.dot_dimension_numbers<[1], [0], [0], [1], [0, 0, 1, 1], [], []>} : vector<16x12xbf16>, vector<12x128xbf16>, vector<16x128xf32> -> vector<16x128xf32>
    %10 = vector.shape_cast %9 : vector<16x128xf32> to vector<1x16x128xf32>
    %c0_5 = arith.constant 0 : index
    %c0_6 = arith.constant 0 : index
    %11 = vector.load %arg3[%c0_5, %c0_6] : memref<1x128xf32, #tpu.memory_space<vmem>>, vector<1x128xf32>
    %12 = vector.shape_cast %11 : vector<1x128xf32> to vector<1x1x128xf32>
    %13 = vector.broadcast %12 : vector<1x1x128xf32> to vector<1x16x128xf32>
    %14 = arith.addf %10, %13 : vector<1x16x128xf32>
    %cst_7 = arith.constant 0.000000e+00 : f32
    %15 = vector.broadcast %cst_7 : f32 to vector<1x16x128xf32>
    %16 = arith.maximumf %14, %15 : vector<1x16x128xf32>
    %17 = arith.truncf %16 : vector<1x16x128xf32> to vector<1x16x128xbf16>
    %cst_8 = arith.constant 0.000000e+00 : bf16
    %18 = vector.broadcast %cst_8 : bf16 to vector<1x4x128xbf16>
    %19 = tpu.concatenate %18, %17 in 1 : vector<1x4x128xbf16>, vector<1x16x128xbf16> -> vector<1x20x128xbf16>
    %20 = vector.extract_strided_slice %19 {offsets = [0, 0, 0], sizes = [1, 16, 128], strides = [1, 1, 1]} : vector<1x20x128xbf16> to vector<1x16x128xbf16>
    %21 = vector.extract_strided_slice %19 {offsets = [0, 2, 0], sizes = [1, 16, 128], strides = [1, 1, 1]} : vector<1x20x128xbf16> to vector<1x16x128xbf16>
    %22 = vector.extract_strided_slice %19 {offsets = [0, 4, 0], sizes = [1, 16, 128], strides = [1, 1, 1]} : vector<1x20x128xbf16> to vector<1x16x128xbf16>
    %23 = tpu.concatenate %20, %21, %22 in 2 : vector<1x16x128xbf16>, vector<1x16x128xbf16>, vector<1x16x128xbf16> -> vector<1x16x384xbf16>
    %24 = vector.shape_cast %23 : vector<1x16x384xbf16> to vector<16x384xbf16>
    %c0_9 = arith.constant 0 : index
    %c0_10 = arith.constant 0 : index
    %25 = vector.load %arg4[%c0_9, %c0_10] : memref<384x128xbf16, #tpu.memory_space<vmem>>, vector<384x128xbf16>
    %cst_11 = arith.constant dense<0.000000e+00> : vector<16x128xf32>
    %26 = tpu.matmul %24, %25, %cst_11 {dimension_numbers = #tpu.dot_dimension_numbers<[1], [0], [0], [1], [0, 0, 1, 1], [], []>} : vector<16x384xbf16>, vector<384x128xbf16>, vector<16x128xf32> -> vector<16x128xf32>
    %27 = vector.shape_cast %26 : vector<16x128xf32> to vector<1x16x128xf32>
    %c0_12 = arith.constant 0 : index
    %c0_13 = arith.constant 0 : index
    %28 = vector.load %arg5[%c0_12, %c0_13] : memref<1x128xf32, #tpu.memory_space<vmem>>, vector<1x128xf32>
    %29 = vector.shape_cast %28 : vector<1x128xf32> to vector<1x1x128xf32>
    %30 = vector.broadcast %29 : vector<1x1x128xf32> to vector<1x16x128xf32>
    %31 = arith.addf %27, %30 : vector<1x16x128xf32>
    %cst_14 = arith.constant 0.000000e+00 : f32
    %32 = vector.broadcast %cst_14 : f32 to vector<1x16x128xf32>
    %33 = arith.maximumf %31, %32 : vector<1x16x128xf32>
    %34 = vector.shape_cast %0 : vector<1x16x4xbf16> to vector<16x4xbf16>
    %c0_15 = arith.constant 0 : index
    %c0_16 = arith.constant 0 : index
    %35 = vector.load %arg6[%c0_15, %c0_16] : memref<4x128xbf16, #tpu.memory_space<vmem>>, vector<4x128xbf16>
    %cst_17 = arith.constant dense<0.000000e+00> : vector<16x128xf32>
    %36 = tpu.matmul %34, %35, %cst_17 {dimension_numbers = #tpu.dot_dimension_numbers<[1], [0], [0], [1], [0, 0, 1, 1], [], []>} : vector<16x4xbf16>, vector<4x128xbf16>, vector<16x128xf32> -> vector<16x128xf32>
    %37 = vector.shape_cast %36 : vector<16x128xf32> to vector<1x16x128xf32>
    %c0_18 = arith.constant 0 : index
    %c0_19 = arith.constant 0 : index
    %38 = vector.load %arg7[%c0_18, %c0_19] : memref<1x128xf32, #tpu.memory_space<vmem>>, vector<1x128xf32>
    %39 = vector.shape_cast %38 : vector<1x128xf32> to vector<1x1x128xf32>
    %40 = vector.broadcast %39 : vector<1x1x128xf32> to vector<1x16x128xf32>
    %41 = arith.addf %37, %40 : vector<1x16x128xf32>
    %42 = arith.addf %33, %41 : vector<1x16x128xf32>
    %cst_20 = arith.constant 0.000000e+00 : f32
    %43 = vector.broadcast %cst_20 : f32 to vector<1x16x128xf32>
    %44 = arith.maximumf %42, %43 : vector<1x16x128xf32>
    %c0_21 = arith.constant 0 : index
    %c0_22 = arith.constant 0 : index
    %c0_23 = arith.constant 0 : index
    %45 = vector.load %arg8[%c0_21, %c0_22, %c0_23] : memref<1x16x128xf32, #tpu.memory_space<vmem>>, vector<1x16x128xf32>
    tpu.vector_store %arg8[%c0_21, %c0_22, %c0_23], %44 {strides = array<i32>} : memref<1x16x128xf32, #tpu.memory_space<vmem>>, vector<1x16x128xf32>,
    return
  }
  func.func @transform_0(%arg0: i32) -> (i32, i32, i32) {
    %c0_i32 = arith.constant 0 : i32
    %c0_i32_0 = arith.constant 0 : i32
    %c0_i32_1 = arith.constant 0 : i32
    return %arg0, %c0_i32, %c0_i32_0 : i32, i32, i32
  }
  func.func @transform_1(%arg0: i32) -> (i32, i32) {
    %c0_i32 = arith.constant 0 : i32
    %c0_i32_0 = arith.constant 0 : i32
    %c0_i32_1 = arith.constant 0 : i32
    return %c0_i32, %c0_i32_0 : i32, i32
  }
  func.func @transform_2(%arg0: i32) -> (i32, i32) {
    %c0_i32 = arith.constant 0 : i32
    %c0_i32_0 = arith.constant 0 : i32
    %c0_i32_1 = arith.constant 0 : i32
    return %c0_i32, %c0_i32_0 : i32, i32
  }
  func.func @transform_3(%arg0: i32) -> (i32, i32) {
    %c0_i32 = arith.constant 0 : i32
    %c0_i32_0 = arith.constant 0 : i32
    %c0_i32_1 = arith.constant 0 : i32
    return %c0_i32, %c0_i32_0 : i32, i32
  }
  func.func @transform_4(%arg0: i32) -> (i32, i32) {
    %c0_i32 = arith.constant 0 : i32
    %c0_i32_0 = arith.constant 0 : i32
    %c0_i32_1 = arith.constant 0 : i32
    return %c0_i32, %c0_i32_0 : i32, i32
  }
  func.func @transform_5(%arg0: i32) -> (i32, i32) {
    %c0_i32 = arith.constant 0 : i32
    %c0_i32_0 = arith.constant 0 : i32
    %c0_i32_1 = arith.constant 0 : i32
    return %c0_i32, %c0_i32_0 : i32, i32
  }
  func.func @transform_6(%arg0: i32) -> (i32, i32) {
    %c0_i32 = arith.constant 0 : i32
    %c0_i32_0 = arith.constant 0 : i32
    %c0_i32_1 = arith.constant 0 : i32
    return %c0_i32, %c0_i32_0 : i32, i32
  }
  func.func @transform_7(%arg0: i32) -> (i32, i32, i32) {
    %c0_i32 = arith.constant 0 : i32
    %c0_i32_0 = arith.constant 0 : i32
    %c0_i32_1 = arith.constant 0 : i32
    return %arg0, %c0_i32, %c0_i32_0 : i32, i32, i32
  }
}

</mosaic_0001>

<bundles_post_ra>
// kernel: tpu_custom_call.1
= control target key start
LH: loop header
LB: loop body
LE: loop exit
PB: predicated region body
PF: predicated region fallthrough
CT: control target
= control target key end

     0   :  { %12 = vsyncpa [#allocation3], 0  ;;  %s1371_s0 = inlined_call_operand.vmem [shape: bf16[2,16,4], index: 0, kind: input, shape index: {}]   ;;  %s1372_s1 = inlined_call_operand.vmem [shape: bf16[12,128], index: 1, kind: input, shape index: {}]   ;;  %s1373_s2 = inlined_call_operand.vmem [shape: f32[1,128], index: 2, kind: input, shape index: {}]   ;;  %s1374_s3 = inlined_call_operand.hbm [shape: bf16[384,128], index: 3, kind: input, shape index: {}]   ;;  %s1375_s4 = inlined_call_operand.vmem [shape: f32[1,128], index: 4, kind: input, shape index: {}]   ;;  %s1376_s5 = inlined_call_operand.vmem [shape: bf16[4,128], index: 5, kind: input, shape index: {}]   ;;  %s1377_s6 = inlined_call_operand.vmem [shape: f32[1,128], index: 6, kind: input, shape index: {}]   ;;  %s1378_s7 = inlined_call_operand.hbm [shape: f32[2,16,128], index: 7, kind: output, shape index: {}]  }
   0x1   :  { %13 = vsyncpa [#allocation4], 0 }
   0x2   :  { %15 = vsyncpa [#allocation4 + $0x1], 0  ;;  %s1185_s24 = smov 0   ;;  %s1187_s25 = smov 0  }
   0x3   :  { %s1189_s26 = smov 0   ;;  %s1191_s27 = smov 0  }
   0x4 LB: > { %s1206_s28 = sadd.s32 4294967295, %s1134_s27   ;;  %s841_s29 = sadd.s32 4294967294, %s1134_s27   ;;  %s1134_s27 = sphi %s1191_s27, %s1394_s27   ;;  %s1130_s26 = sphi %s1189_s26, %s1393_s26   ;;  %s1126_s25 = sphi %s1187_s25, %s1392_s25   ;;  %s1122_s24 = sphi %s1185_s24, %s1391_s24  }
   0x5   : > { %s1210_s30 = sadd.s32 1, %s1134_s27   ;;  %s180_s8 = sadd.s32 1, %s1130_s26 }
   0x6   : > { %s177_s9 = ssub.s32 %s1134_s27, %s1210_s30  ;;  %p190_p0 = scmp.ne.s32.totalorder %s1130_s26, %s1126_s25 }
   0x7   : > { %p178_p1 = scmp.eq.s32.totalorder %s177_s9, 0  ;;  %p191_p2 = scmp.eq.s32.totalorder %s1206_s28, 1 }
   0x8   : > { %p196_p3 = scmp.ne.s32.totalorder %s1126_s25, %s1122_s24  ;;  %p197_p4 = scmp.eq.s32.totalorder %s841_s29, 1 }
   0x9   : > { %s1221_s10 = scalar_select %p178_p1, %s1130_s26, %s180_s8  }
   0xa   : > { %p1223_p5 = por %p191_p2, %p190_p0  ;;  %p1227_p6 = por %p197_p4, %p196_p3 }
   0xb   : > { %p842_p7 = scmp.ge.s32.totalorder %s1134_s27, 1  ;;  %p204_p8 = scmp.lt.s32.totalorder %s1134_s27, 3 }
   0xc   : > { %s1382_s11 = scalar_select %p1223_p5, 1, 0 }
   0xd   : > { %s1383_s12 = scalar_select %p1227_p6, 1, 0 }
   0xe   : > { %p1379_p9 = scmp.eq.s32.totalorder %s1206_s28, 0  ;;  %p1234_p10 = pnand %p842_p7, %p204_p8 }
   0xf   : > { %s1136_s14 = smov [#allocation2]   ;;  %s1040_s19 = scalar_lea.hbm %s1374_s3, 3072 }
  0x10   : > { %s1384_s13 = scalar_select %p1234_p10, 1, 0 }
  0x11   : > { %s222_s15 = sshll.u32 %s1136_s14, 4  ;;  %p963_p11 = pneg %p1234_p10  ;;  %s223_s15 = int_to_ptr.vmem [resolvable:$true] %s222_s15 }
  0x12   : > { %p1041_p13 = scmp.ne.s32.totalorder %s1374_s3, %s1040_s19  ;;  %p1047_p3 = scmp.lt.u32.totalorder %s1040_s19, %s1374_s3 }
  0x13   : > { %p1242_p12 = pnand %p1379_p9, %p963_p11 }
  0x15   : > { %p1042_p0 = pneg %p1242_p12 }
  0x17   : > { %p1043_p1 = pnand %p1042_p0, %p1041_p13 }
  0x19   : > { %p1044_p2 = pneg %p1043_p1 }
  0x1b   : > { %p1049_p4 = pnand %p1047_p3, %p1044_p2 }
  0x1d   : > { %1052 = shalt.err (!%p1049_p4)
}
  0x1e   : > { %s1053_s29 = scalar_lea.vmem %s223_s15, 3072  ;;  %p1061_p9 = scmp.lt.s32.totalorder %s223_s15, %s223_s15 }
  0x1f   : > { %p1054_p7 = scmp.ne.s32.totalorder %s223_s15, %s1053_s29  ;;  %p1062_p6 = scmp.lt.s32.totalorder %s1053_s29, %s1053_s29 }
  0x21   : > { %p1056_p8 = pnand %p1054_p7, %p1042_p0  ;;  %p1063_p5 = por %p1062_p6, %p1061_p9 }
  0x23   : > { %p1057_p11 = pneg %p1056_p8 }
  0x25   : > { %p1064_p10 = pnand %p1063_p5, %p1057_p11 }
  0x27   : > { %1067 = shalt.err (!%p1064_p10)
}
  0x28   : > { %s1137_s8 = smov 64   ;;  %s1138_s9 = smov 4  }
  0x29   : > { %966 = dma.hbm_to_vmem [thread:$0]  (!%p1242_p12), %s1374_s3, 3072, %s223_s15, [#allocation3], %s1137_s8, %s1137_s8, %s1138_s9  }
  0x2a   : > { %p1386_p13 = scmp.ne.s32.totalorder %s1384_s13, 0 }
  0x2b   : > { %p1387_p1 = scmp.eq.s32.totalorder (!%p1386_p13), %s1206_s28, 0 }
  0x2c   : > { %255 = sbr.rel (%p1386_p13) target bundleno = 655 (0x28f), region = 48 }
  0x33   : > { %1113 = dma.done.wait (%p1387_p1), [#allocation3], 3072   ;;  %p1388_p0 = pmov %p1387_p1 }
  0x34   : > { %p287_p5 = scmp.lt.s32.totalorder %s1206_s28, 1  ;;  %v1139_v0 = vmov 0.0   ;;  %vm301_vm0 = vcmask 1041408   ;;  %vm306_vm1 = vcmask 1046528   ;;  %vm1140_vm2 = vmmov 0   ;;  %v1016_v4 = vld [vmem:[#allocation2 + $0x40] sm:$0xff]  }
  0x35   : > { %1115 = vsyncadd (%p1388_p0), [#allocation3], 4294964224  ;;  %925 = vmatprep.subr.bf16.mxu0 %v1139_v0  ;;  %927 = vmatprep.mubr.msk.bf16.mxu0 %vm1140_vm2, %v1139_v0  ;;  %vm312_vm3 = vcmask 1045504   ;;  %v1015_v2 = vld [vmem:[%s1372_s1] sm:$0x3f]   ;;  %v1019_v12 = vld [vmem:[#allocation2 + $0x48] sm:$0xff]  }
  0x36   : > { %s288_s18 = scalar_select %p287_p5, %s1206_s28, 1  ;;  %v336_v5 = vsel %vm312_vm3, %v1015_v2, 0  ;;  %v1017_v6 = vld [vmem:[#allocation2] sm:$0xff]   ;;  %892 = vmatprep.subr.bf16.mxu1 %v1016_v4  ;;  %v1020_v14 = vld [vmem:[#allocation2 + $0x8] sm:$0xff]   ;;  %v1022_v16 = vld [vmem:[#allocation2 + $0x50] sm:$0xff]   ;;  %vm318_vm4 = vcmask 31744  }
  0x37   : > { %926 = vmatpush3.bf16.msra.mxu0 %v336_v5  ;;  %893 = vmatpush3.bf16.msra.mxu1 %v1017_v6  ;;  %s1141_s22 = smov 4   ;;  %v1023_v17 = vld [vmem:[#allocation2 + $0x10] sm:$0xff]   ;;  %s1142_s23 = smov 8   ;;  %v1025_v18 = vld [vmem:[#allocation2 + $0x58] sm:$0xff]   ;;  %v1028_v20 = vld [vmem:[#allocation2 + $0x60] sm:$0xff]   ;;  %vm321_vm5 = vcmask 64512  }
  0x38   : > { %s888_s16 = sshll.u32 %s288_s18, 3  ;;  %931 = vmatprep.subr.bf16.mxu0 %v1139_v0  ;;  %894 = vmatprep.subr.bf16.mxu1 %v1019_v12  ;;  %v1026_v19 = vld [vmem:[#allocation2 + $0x18] sm:$0xff]   ;;  %vm331_vm6 = vcmask 97280   ;;  %v1018_v22 = vld [vmem:[#allocation2 + $0x80] sm:$0xff]   ;;  %v1021_v26 = vld [vmem:[#allocation2 + $0x88] sm:$0xff]   ;;  %s284_s17 = sand.u32 1, %s1126_s25  }
  0x39   : > { %s291_s15 = scalar_lea.vmem %s1371_s0, %s888_s16  ;;  %v1024_v27 = vld [vmem:[#allocation2 + $0x90] sm:$0xff]   ;;  %v1027_v28 = vld [vmem:[#allocation2 + $0x98] sm:$0xff]   ;;  %v1030_v29 = vld [vmem:[#allocation2 + $0xa0] sm:$0xff]   ;;  %s847_s19 = sshll.u32 %s284_s17, 4 }
  0x3a   : > { %v1276_v1 = vld [vmem:[%s291_s15] sm:$0xff]   ;;  %v1031_v31 = vld [vmem:[#allocation2 + $0x68] sm:$0xff]   ;;  %v1034_v34 = vld [vmem:[#allocation2 + $0x70] sm:$0xff]   ;;  %s286_s13 = scalar_lea.vmem [#allocation5], %s847_s19  ;;  %s1329_s14 = scalar_lea.sflag [#allocation4], %s284_s17 }
  0x3b   : > { %v300_v3 = vrot.slane %v1276_v1, 6  ;;  %895 = vmatpush3.bf16.msra.mxu1 %v1020_v14  ;;  %v1029_v30 = vld [vmem:[#allocation2 + $0x20] sm:$0xff]   ;;  %v1033_v32 = vld [vmem:[#allocation2 + $0xa8] sm:$0xff]   ;;  %v1036_v35 = vld [vmem:[#allocation2 + $0xb0] sm:$0xff]   ;;  %s767_s21 = sshll.u32 %s286_s13, 4  ;;  %p1389_p9 = scmp.ne.s32.totalorder %s1382_s11, 0  ;;  %s1322_s21 = int_to_ptr.vmem [resolvable:$true] %s767_s21 }
  0x3c   : > { %896 = vmatprep.subr.bf16.mxu1 %v1022_v16  ;;  %v1032_v33 = vld [vmem:[#allocation2 + $0x28] sm:$0xff]   ;;  %v1035_v36 = vld [vmem:[#allocation2 + $0x30] sm:$0xff]   ;;  %v1037_v37 = vld [vmem:[#allocation2 + $0x78] sm:$0xff]   ;;  %s1068_s18 = scalar_lea.vmem %s1322_s21, 256 }
  0x3d   : > { %v304_v7 = vsel %vm301_vm0, 0, %v300_v3  ;;  %v308_v8 = vrot.slane %v300_v3, 1  ;;  %v314_v9 = vrot.slane %v300_v3, 2  ;;  %v1038_v38 = vld [vmem:[#allocation2 + $0x38] sm:$0xff]   ;;  %v853_v40 = vld [vmem:[%s1373_s2] ss:$0 sm:$0xff]  ;;  %vm878_vm7 = vmneg %vm301_vm0  ;;  %p1069_p6 = scmp.ne.s32.totalorder %s1322_s21, %s1068_s18 }
  0x3e   : > { %v307_v10 = vrot.slane %v304_v7, 1  ;;  %v313_v11 = vrot.slane %v304_v7, 2  ;;  %v1039_v39 = vld [vmem:[#allocation2 + $0xb8] sm:$0xff]   ;;  %v690_v54 = vld [vmem:[%s1376_s5] sm:$0x3] }
  0x3f   : > { %897 = vmatpush3.bf16.msra.mxu1 %v1023_v17  ;;  %v695_v59 = vsel %vm301_vm0, %v690_v54, 0  ;;  %v880_v6 = vld [vmem:[%s1375_s4] ss:$0 sm:$0xff]  ;;  %p1070_p10 = pnand %p1069_p6, %p1389_p9 }
  0x40   : > { %v309_v13 = vsel %vm306_vm1, %v307_v10, %v308_v8  ;;  %v315_v15 = vsel %vm312_vm3, %v313_v11, %v314_v9  ;;  %898 = vmatprep.subr.bf16.mxu1 %v1025_v18  ;;  %v882_v10 = vld [vmem:[%s1377_s6] ss:$0 sm:$0xff] }
  0x41   : > { %310 = vrot.lane.b32.xlu0 %v309_v13, %s1141_s22  ;;  %s889_s22 = sshll.u32 %s1206_s28, 8  ;;  %p1071_p12 = pneg %p1070_p10 }
  0x42   : > { %s1327_s9 = scalar_lea.hbm %s1378_s7, %s889_s22  ;;  %s1143_s28 = smov [#allocation5]  }
  0x43   : > { %899 = vmatpush3.bf16.msra.mxu1 %v1026_v19  ;;  %s1072_s16 = sshll.u32 %s1143_s28, 4  ;;  %s1073_s16 = int_to_ptr.vmem [resolvable:$false] %s1072_s16 }
  0x44   : > { %900 = vmatprep.subr.bf16.mxu1 %v1028_v20  ;;  %s1074_s19 = scalar_lea.vmem %s1073_s16, 512  ;;  %p1075_p2 = scmp.lt.s32.totalorder %s1322_s21, %s1073_s16 }
  0x45   : > { %316 = vrot.lane.b32.xlu0 %v315_v15, %s1142_s23  ;;  %p1076_p3 = scmp.lt.s32.totalorder %s1074_s19, %s1068_s18 }
  0x47   : > { %901 = vmatpush3.bf16.msra.mxu1 %v1029_v30  ;;  %p1077_p4 = por %p1076_p3, %p1075_p2 }
  0x48   : > { %902 = vmatprep.subr.bf16.mxu1 %v1031_v31 }
  0x49   : > { %p1078_p7 = pnand %p1077_p4, %p1071_p12 }
  0x4b   : > { %903 = vmatpush3.bf16.msra.mxu1 %v1032_v33 }
  0x4c   : > { %904 = vmatprep.subr.bf16.mxu1 %v1034_v34 }
  0x4f   : > { %905 = vmatpush3.bf16.msra.mxu1 %v1035_v36 }
  0x50   : > { %906 = vmatprep.subr.bf16.mxu1 %v1037_v37 }
  0x53   : > { %907 = vmatpush3.bf16.msra.mxu1 %v1038_v38 }
  0x54   : > { %951 = vmatprep.subr.bf16.mxu1 %v1139_v0 }
  0xb3   : > { %v311_v21 = vpop.permute.xlu0 %310 }
  0xb4   : > { %v320_v23 = vsel %vm318_vm4, %v304_v7, %v311_v21 }
  0xb7   : > { %v317_v24 = vpop.permute.xlu0 %316 }
  0xb8   : > { %v323_v25 = vsel %vm321_vm5, %v320_v23, %v317_v24 }
  0xb9   : > { %928 = vmatmul.mubr.msk.bf16.vlgmr.msra.gmra.mrb[0].mxu0 %vm331_vm6, %v323_v25 }
  0xba   : > { %932 = vmatpush3.bf16.msra.mxu0 %v1018_v22  ;;  %947 = vmatprep.mubr.msk.bf16.mxu0 %vm1140_vm2, %v1139_v0 }
  0xbb   : > { %933 = vmatprep.subr.bf16.mxu0 %v1139_v0 }
  0xbe   : > { %934 = vmatpush3.bf16.msra.mxu0 %v1021_v26 }
  0xbf   : > { %935 = vmatprep.subr.bf16.mxu0 %v1139_v0 }
  0xc2   : > { %936 = vmatpush3.bf16.msra.mxu0 %v1024_v27 }
  0xc3   : > { %937 = vmatprep.subr.bf16.mxu0 %v1139_v0 }
  0xc6   : > { %938 = vmatpush3.bf16.msra.mxu0 %v1027_v28 }
  0xc7   : > { %939 = vmatprep.subr.bf16.mxu0 %v1139_v0 }
  0xca   : > { %940 = vmatpush3.bf16.msra.mxu0 %v1030_v29 }
  0xcb   : > { %941 = vmatprep.subr.bf16.mxu0 %v1139_v0 }
  0xce   : > { %942 = vmatpush3.bf16.msra.mxu0 %v1033_v32 }
  0xcf   : > { %943 = vmatprep.subr.bf16.mxu0 %v1139_v0 }
  0xd2   : > { %944 = vmatpush3.bf16.msra.mxu0 %v1036_v35 }
  0xd3   : > { %945 = vmatprep.subr.bf16.mxu0 %v1139_v0 }
  0xd6   : > { %946 = vmatpush3.bf16.msra.mxu0 %v1039_v39 }
 0x18c   : > { %v372_v41 = vpop.f32.mrb[0].mxu0 }
 0x18d   : > { %v386_v42 = vadd.f32 %v853_v40, %v372_v41  ;;  %v929_v43 = vpop.f32.mrb[1].mxu0 }
 0x18e   : > { %v375_v44 = vpop.f32.mrb[2].mxu0 }
 0x18f   : > { %v387_v45 = vadd.f32 %v853_v40, %v375_v44  ;;  %v930_v46 = vpop.f32.mrb[3].mxu0  ;;  %v388_v47 = vmax.f32 %v386_v42, 0.0 }
 0x191   : > { %v389_v48 = vmax.f32 %v387_v45, 0.0 }
 0x193   : > { %v390_v49 = vpack.c.bf16 %v389_v48, %v388_v47 }
 0x195   : > { %v392_v50 = vrot.slane %v390_v49, 6 }
 0x197   : > { %v394_v51 = vsel %vm301_vm0, 0, %v392_v50  ;;  %v398_v52 = vrot.slane %v392_v50, 1  ;;  %v402_v53 = vrot.slane %v392_v50, 2 }
 0x198   : > { %v397_v55 = vrot.slane %v394_v51, 1  ;;  %v401_v56 = vrot.slane %v394_v51, 2 }
 0x19a   : > { %v399_v57 = vsel %vm306_vm1, %v397_v55, %v398_v52  ;;  %v403_v58 = vsel %vm312_vm3, %v401_v56, %v402_v53 }
 0x19b   : > { %629 = vmatprep.mubr.bf16.mxu1 %v399_v57  ;;  %948 = vmatmul.mubr.bf16.vlgmr.msra.gmra.mrb[4].mxu0 %v403_v58 }
 0x19c   : > { %879 = vmatmul.mubr.msk.bf16.vlgmr.msra.gmra.mrb[0].mxu1 %vm878_vm7, %v392_v50 }
 0x19d   : > { %952 = vmatpush3.bf16.msra.mxu1 %v695_v59  ;;  %953 = vmatprep.mubr.msk.bf16.mxu1 %vm1140_vm2, %v1139_v0 }
 0x1a4   : > { %954 = vmatmul.mubr.msk.bf16.vlgmr.msra.gmra.mrb[4].mxu1 %vm318_vm4, %v1276_v1 }
 0x26e   : > { %v672_v60 = vpop.f32.mrb[4].mxu0 }
 0x26f   : > { %v908_v61 = vpop.f32.mrb[0].mxu1  ;;  %v949_v62 = vpop.f32.mrb[5].mxu0 }
 0x270   : > { %v909_v63 = vpop.f32.mrb[1].mxu1  ;;  %v675_v2 = vpop.f32.mrb[6].mxu0 }
 0x271   : > { %v910_v3 = vadd.f32 %v909_v63, %v908_v61  ;;  %v911_v4 = vpop.f32.mrb[2].mxu1  ;;  %v950_v5 = vpop.f32.mrb[7].mxu0 }
 0x272   : > { %v912_v7 = vpop.f32.mrb[3].mxu1 }
 0x273   : > { %v673_v8 = vadd.f32 %v910_v3, %v672_v60  ;;  %v913_v9 = vadd.f32 %v912_v7, %v911_v4 }
 0x275   : > { %v686_v0 = vadd.f32 %v880_v6, %v673_v8  ;;  %v676_v1 = vadd.f32 %v913_v9, %v675_v2 }
 0x277   : > { %v687_v11 = vadd.f32 %v880_v6, %v676_v1  ;;  %v688_v12 = vmax.f32 %v686_v0, 0.0  ;;  %v731_v13 = vpop.f32.mrb[4].mxu1 }
 0x278   : > { %v745_v14 = vadd.f32 %v882_v10, %v731_v13  ;;  %v955_v15 = vpop.f32.mrb[5].mxu1 }
 0x279   : > { %v689_v16 = vmax.f32 %v687_v11, 0.0  ;;  %v734_v17 = vpop.f32.mrb[6].mxu1 }
 0x27a   : > { %v747_v18 = vadd.f32 %v745_v14, %v688_v12  ;;  %v746_v19 = vadd.f32 %v882_v10, %v734_v17  ;;  %v956_v20 = vpop.f32.mrb[7].mxu1 }
 0x27c   : > { %v749_v21 = vmax.f32 %v747_v18, 0.0  ;;  %v748_v22 = vadd.f32 %v746_v19, %v689_v16 }
 0x27e   : > { %751 = vst [vmem:[%s286_s13] sm:$0xff] %v749_v21  ;;  %v750_v23 = vmax.f32 %v748_v22, 0.0 }
 0x280   : > { %752 = vst [vmem:[%s286_s13 + $0x8] sm:$0xff] %v750_v23 }
 0x281   : > { %1081 = shalt.err (!%p1078_p7)
}
 0x282   : > { %s1082_s17 = scalar_lea.hbm %s1327_s9, 256  ;;  %s1086_s13 = scalar_lea.hbm %s1378_s7, 512 }
 0x283   : > { %p1083_p8 = scmp.ne.s32.totalorder %s1327_s9, %s1082_s17  ;;  %p1087_p1 = scmp.lt.u32.totalorder %s1327_s9, %s1378_s7 }
 0x284   : > { %p1088_p0 = scmp.lt.u32.totalorder %s1086_s13, %s1082_s17  ;;  %p1090_p6 = scmp.lt.u32.totalorder %s1082_s17, %s1327_s9 }
 0x285   : > { %p1084_p11 = pnand %p1083_p8, %p1389_p9 }
 0x286   : > { %p1089_p5 = por %p1088_p0, %p1087_p1 }
 0x287   : > { %p1085_p13 = pneg %p1084_p11 }
 0x288   : > { %p1091_p10 = por %p1090_p6, %p1089_p5 }
 0x28a   : > { %p1092_p12 = pnand %p1091_p10, %p1085_p13 }
 0x28c   : > { %1095 = shalt.err (!%p1092_p12)
}
 0x28d   : > { %s1144_s8 = smov 128  }
 0x28e   : > { %961 = dma.vmem_to_hbm [thread:$0]  (%p1389_p9), %s1322_s21, 256, %s1327_s9, %s1329_s14, %s1144_s8, %s1144_s8, %s1142_s23  }
 0x28f PF: > { %p973_p2 = scmp.ge.s32.totalorder %s1134_s27, 2  ;;  %s782_s18 = sand.u32 1, %s1122_s24  }
 0x290   : > { %p1390_p3 = scmp.ne.s32.totalorder %s1383_s12, 0  ;;  %s783_s28 = scalar_lea.sflag [#allocation4], %s782_s18 }
 0x292   : > { %p968_p4 = pnand %p973_p2, %p1390_p3 }
 0x294   : > { %1117 = dma.done.wait (!%p968_p4), %s783_s28, 256  }
 0x295   : > { %1119 = vsyncadd (!%p968_p4), %s783_s28, 4294967040  ;;  %p18_p7 = scmp.ge.s32.totalorder %s1210_s30, 4   ;;  %s1391_s24 = smov %s1126_s25 }
 0x296   : > { %s1392_s25 = smov %s1130_s26  ;;  %s1393_s26 = smov %s1221_s10 }
 0x297   : > { %s1394_s27 = smov %s1210_s30  ;;  %20 = sbr.rel (!%p18_p7) target bundleno = 4 (0x4), region = 88 }
 0x29e   :  { %788 = vsyncpa [#allocation3], 1 }
 0x29f   :  { %790 = vsyncpa [#allocation3 + $0x1], 1 }
 0x2a0   :  { %791 = vsyncpa [#allocation4], 1 }
 0x2a1   :  { %793 = vsyncpa [#allocation4 + $0x1], 1 }

</bundles_post_ra>
